<compile_context>
chip_gen: v7x
topology: tpu7x:2x2x1
jax: 0.10.0
libtpu: 0.0.40
codegen_flags: <defaults>
</compile_context>

<pallas_src>
import numpy as np
import jax
import jax.numpy as jnp
from jax.experimental import pallas as pl
from jax.experimental.pallas import tpu as pltpu

# ---- configuration (small shapes consistent with the module) ----
D_MODEL = 32
NHEAD = 2
DIM_FF = 64
CF = 2            # CustomizedAttn compression_factor default
SEQ = 8
BATCH = 1         # required by torch.cat((null_k, k), dim=1) in the original code
NUM_LAYERS = 2    # TransformerEncoder stacks num_layers copies of the layer


def _layer_norm(x, w, b, eps=1e-5):
    mu = jnp.mean(x, axis=-1, keepdims=True)
    xc = x - mu
    var = jnp.mean(xc * xc, axis=-1, keepdims=True)
    return xc * jax.lax.rsqrt(var + eps) * w + b


# ------------------------------------------------------------------ packing --
def _row_offsets(d, ff, cf, n_c8):
    off, o = {}, 0
    off['wq'] = o;    o += d          # Wq^T
    off['wkc'] = o;   o += cf * d     # Wk^T @ Wc_r  (stacked over taps)
    off['wvc'] = o;   o += cf * d     # Wv^T @ Wc_r
    off['mask'] = o;  o += d          # scale * block-diag head mask
    off['mnull'] = o; o += d          # scale * blockdiag(outer(null_k, null_v))
    off['wo'] = o;    o += d          # Wo^T
    off['w2'] = o;    o += ff         # W2^T
    off['biasc'] = o; o += n_c8       # conv bias rows (zero past n_c)
    off['vec'] = o;   o += 8          # bo, ln1w, ln1b, b2, ln2w, ln2b, pad, pad
    off['total'] = o
    return off


def _make_sel(t, cf, n_c, n_c8, pad):
    # row-gather matrix: front zero-pad by `pad`, stride-cf, one block per tap.
    # Rows n_c..n_c8-1 of each tap block are zero so downstream slices stay
    # 8-row aligned and padded rows contribute exactly zero.
    sel = np.zeros((cf * n_c8, t), np.float32)
    for r in range(cf):
        for j in range(n_c):
            i = j * cf + r - pad
            if 0 <= i < t:
                sel[r * n_c8 + j, i] = 1.0
    return sel


def pack_params(layer_params, t):
    """Pack per-layer parameters into two VMEM slabs + one shared gather matrix.
    Built ONCE; reused on every forward call (no per-call numpy work)."""
    d, h, cf, ff = D_MODEL, NHEAD, CF, DIM_FF
    dh = d // h
    scale = float(d) ** -0.5           # original scales by d_model**-0.5
    pad = cf - t % cf                  # full extra block when t % cf == 0, as in the torch code
    n_c = (t + pad) // cf
    n_c8 = ((n_c + 7) // 8) * 8
    off = _row_offsets(d, ff, cf, n_c8)

    sel = _make_sel(t, cf, n_c, n_c8, pad)

    # per-head block-diagonal mask, pre-scaled by d_model**-0.5
    mask = np.zeros((d, d), np.float32)
    for g in range(h):
        mask[g * dh:(g + 1) * dh, g * dh:(g + 1) * dh] = 1.0
    mask_s = scale * mask

    pd_all, pf_all = [], []
    for p in layer_params:
        P = {k: np.asarray(v, np.float32) for k, v in p.items()}
        pd = np.zeros((off['total'], d), np.float32)
        pd[off['wq']:off['wq'] + d] = P['wq'].T
        # grouped strided Conv1d -> block-diagonal tap matrices, fused with Wk / Wv
        for r in range(cf):
            wc_r = np.zeros((d, d), np.float32)
            for g in range(h):
                sl = slice(g * dh, (g + 1) * dh)
                wc_r[sl, sl] = P['conv_w'][sl, :, r].T
            pd[off['wkc'] + r * d: off['wkc'] + (r + 1) * d] = P['wk'].T @ wc_r
            pd[off['wvc'] + r * d: off['wvc'] + (r + 1) * d] = P['wv'].T @ wc_r
        pd[off['mask']:off['mask'] + d] = mask_s
        pd[off['mnull']:off['mnull'] + d] = mask_s * np.outer(P['null_k'], P['null_v'])
        pd[off['wo']:off['wo'] + d] = P['wo'].T
        pd[off['w2']:off['w2'] + ff] = P['w2'].T
        pd[off['biasc']:off['biasc'] + n_c] = P['conv_b'][None, :]
        vec = np.zeros((8, d), np.float32)
        vec[0], vec[1], vec[2] = P['bo'], P['ln1w'], P['ln1b']
        vec[3], vec[4], vec[5] = P['b2'], P['ln2w'], P['ln2b']
        pd[off['vec']:off['vec'] + 8] = vec
        pd_all.append(pd)

        pf = np.zeros((d + 8, ff), np.float32)
        pf[:d] = P['w1'].T
        pf[d] = P['b1']
        pf_all.append(pf)

    return dict(
        pd=jnp.asarray(np.stack(pd_all)),      # (L, R_d, d)   d-column slab
        pf=jnp.asarray(np.stack(pf_all)),      # (L, d+8, ff)  ff-column slab
        sel=jnp.asarray(sel),                  # (cf*n_c8, t)  shared gather
        meta=dict(t=t, d=d, ff=ff, cf=cf, n_c8=n_c8, off=off),
    )


# ------------------------------------------------------------------- kernel --
def make_kernel(t, d, ff, cf, n_c8, off):
    o_wq, o_wkc, o_wvc = off['wq'], off['wkc'], off['wvc']
    o_mask, o_mnull, o_wo = off['mask'], off['mnull'], off['wo']
    o_w2, o_biasc, o_vec = off['w2'], off['biasc'], off['vec']

    def kernel(x_ref, sel_ref, pd_ref, pf_ref, out_ref, carry_ref):
        f32 = jnp.float32
        layer = pl.program_id(0)

        @pl.when(layer == 0)
        def _init():
            carry_ref[...] = x_ref[0:t, :]          # layer-0 src

        pos = x_ref[t:2 * t, :]                     # positional encoding (every layer)
        xsrc = carry_ref[...]                       # (t, d) current layer input
        xq = xsrc + pos                             # queries / keys use src + pos

        # ---- compressed K / V: gather (zero-pad + stride) then fused conv taps
        sel = sel_ref[...]                          # (cf*n_c8, t)
        gk = jnp.dot(sel, xq, preferred_element_type=f32)
        gv = jnp.dot(sel, xsrc, preferred_element_type=f32)
        kc = pd_ref[o_biasc:o_biasc + n_c8, :]      # conv bias rows (zero past n_c)
        vc = kc
        for r in range(cf):
            wkc_r = pd_ref[o_wkc + r * d: o_wkc + (r + 1) * d, :]
            wvc_r = pd_ref[o_wvc + r * d: o_wvc + (r + 1) * d, :]
            kc = kc + jnp.dot(gk[r * n_c8:(r + 1) * n_c8, :], wkc_r,
                              preferred_element_type=f32)
            vc = vc + jnp.dot(gv[r * n_c8:(r + 1) * n_c8, :], wvc_r,
                              preferred_element_type=f32)

        # ---- attention: softmax is dead code in the original forward, so
        #      att = q @ (scale * blockdiag(kc^T vc) + M_null)
        q = jnp.dot(xq, pd_ref[o_wq:o_wq + d, :], preferred_element_type=f32)
        m_core = jax.lax.dot_general(kc, vc, (((0,), (0,)), ((), ())),
                                     preferred_element_type=f32)       # kc^T @ vc
        m = pd_ref[o_mask:o_mask + d, :] * m_core + pd_ref[o_mnull:o_mnull + d, :]
        att = jnp.dot(q, m, preferred_element_type=f32)

        vec = pd_ref[o_vec:o_vec + 8, :]
        bo, ln1w, ln1b = vec[0:1, :], vec[1:2, :], vec[2:3, :]
        b2, ln2w, ln2b = vec[3:4, :], vec[4:5, :], vec[5:6, :]

        # ---- to_out + residual + norm1
        proj = jnp.dot(att, pd_ref[o_wo:o_wo + d, :], preferred_element_type=f32) + bo
        x = _layer_norm(xsrc + proj, ln1w, ln1b)

        # ---- feed-forward (relu) + residual + norm2   (dropouts are identity)
        h1 = jnp.maximum(
            jnp.dot(x, pf_ref[0:d, :], preferred_element_type=f32) + pf_ref[d:d + 1, :],
            0.0)
        x2 = jnp.dot(h1, pd_ref[o_w2:o_w2 + ff, :], preferred_element_type=f32) + b2
        xo = _layer_norm(x + x2, ln2w, ln2b)

        carry_ref[...] = xo                         # feeds the next layer
        out_ref[...] = xo                           # last layer's value is flushed

    return kernel


def build_forward(packed):
    meta = packed['meta']
    t, d, ff, cf, n_c8, off = (meta['t'], meta['d'], meta['ff'],
                               meta['cf'], meta['n_c8'], meta['off'])
    n_layers = packed['pd'].shape[0]
    kernel = make_kernel(t, d, ff, cf, n_c8, off)

    grid_spec = pltpu.PrefetchScalarGridSpec(
        num_scalar_prefetch=0,
        grid=(n_layers,),
        in_specs=[
            pl.BlockSpec((2 * t, d), lambda l: (0, 0)),                # [src ; pos]
            pl.BlockSpec(packed['sel'].shape, lambda l: (0, 0)),       # gather matrix
            pl.BlockSpec((None, off['total'], d), lambda l: (l, 0, 0)),  # per-layer d-slab
            pl.BlockSpec((None, d + 8, ff), lambda l: (l, 0, 0)),        # per-layer ff-slab
        ],
        out_specs=pl.BlockSpec((t, d), lambda l: (0, 0)),
        scratch_shapes=[pltpu.VMEM((t, d), jnp.float32)],              # activation carry
    )
    call = pl.pallas_call(
        kernel,
        out_shape=jax.ShapeDtypeStruct((t, d), jnp.float32),
        grid_spec=grid_spec,
        compiler_params=pltpu.CompilerParams(
            # layers carry a dependency through the VMEM scratch -> sequential grid
            dimension_semantics=("arbitrary",)),
    )

    @jax.jit
    def forward(src, pos, pd, pf, sel):
        assert src.shape[1] == 1, "batch must be 1 (torch.cat with null_k requires it)"
        x_in = jnp.concatenate([src[:, 0, :], pos[:, 0, :]], axis=0)   # (2t, d)
        out = call(x_in, sel, pd, pf)
        return out[:, None, :]

    return forward


# ---------------- pure-JAX reference (mirrors the PyTorch ops) ----------------
def reference_layer(src, pos, p):
    qk = src + pos
    k = jnp.transpose(qk, (1, 0, 2))
    q = jnp.transpose(qk, (1, 0, 2))
    value = jnp.transpose(src, (1, 0, 2))
    b, t, d = k.shape
    h, cf = NHEAD, CF
    k = k @ p['wk'].T
    q = q @ p['wq'].T
    v = value @ p['wv'].T
    pad = cf - t % cf
    k = jnp.pad(k, ((0, 0), (pad, 0), (0, 0)))
    v = jnp.pad(v, ((0, 0), (pad, 0), (0, 0)))

    def compress(x):
        xm = jnp.transpose(x, (0, 2, 1))                      # (b, d, t_pad)
        y = jax.lax.conv_general_dilated(
            xm, p['conv_w'], (cf,), 'VALID',
            dimension_numbers=('NCH', 'OIH', 'NCH'), feature_group_count=h)
        y = y + p['conv_b'][None, :, None]
        return jnp.transpose(y, (0, 2, 1))

    k, v = compress(k), compress(v)
    k = jnp.concatenate([p['null_k'][None, None, :], k], axis=1)
    v = jnp.concatenate([p['null_v'][None, None, :], v], axis=1)

    def split(x):
        return jnp.transpose(x.reshape(x.shape[0], x.shape[1], h, -1), (0, 2, 1, 3))

    q, k, v = split(q), split(k), split(v)
    dots = jnp.einsum('bhid,bhjd->bhij', q, k) * d ** (-0.5)
    attn = dots                          # original: attn = dropout(dots); softmax discarded
    out = jnp.einsum('bhij,bhjd->bhid', attn, v)
    out = jnp.transpose(out, (0, 2, 1, 3)).reshape(b, t, d)
    out = out @ p['wo'].T + p['bo']
    src2 = jnp.transpose(out, (1, 0, 2))

    x = src + src2
    x = _layer_norm(x, p['ln1w'], p['ln1b'])
    h1 = jax.nn.relu(x @ p['w1'].T + p['b1'])
    x2 = h1 @ p['w2'].T + p['b2']
    x = x + x2
    x = _layer_norm(x, p['ln2w'], p['ln2b'])
    return x


def reference_forward(src, pos, layer_params):
    out = src
    for p in layer_params:                 # TransformerEncoder: stack of layers
        out = reference_layer(out, pos, p)
    return out


def init_params(key):
    d, h, ff, cf = D_MODEL, NHEAD, DIM_FF, CF
    ks = jax.random.split(key, 17)
    n = lambda k, shape, s=0.05: jax.random.normal(k, shape, jnp.float32) * s
    return dict(
        wq=n(ks[0], (d, d)), wk=n(ks[1], (d, d)), wv=n(ks[2], (d, d)),
        wo=n(ks[3], (d, d)), bo=n(ks[4], (d,)),
        conv_w=n(ks[5], (d, d // h, cf)), conv_b=n(ks[6], (d,)),
        null_k=n(ks[7], (d,)), null_v=n(ks[8], (d,)),
        w1=n(ks[9], (ff, d)), b1=n(ks[10], (ff,)),
        w2=n(ks[11], (d, ff)), b2=n(ks[12], (d,)),
        ln1w=1.0 + n(ks[13], (d,), 0.1), ln1b=n(ks[14], (d,), 0.1),
        ln2w=1.0 + n(ks[15], (d,), 0.1), ln2b=n(ks[16], (d,), 0.1),
    )


if __name__ == "__main__":
    key = jax.random.PRNGKey(0)
    keys = jax.random.split(key, 2 + NUM_LAYERS)
    src = jax.random.normal(keys[0], (SEQ, BATCH, D_MODEL), jnp.float32)
    pos = jax.random.normal(keys[1], (SEQ, BATCH, D_MODEL), jnp.float32)
    layer_params = [init_params(k) for k in keys[2:]]

    packed = pack_params(layer_params, SEQ)   # host-side constants built once
    forward = build_forward(packed)           # pallas_call traced once under jit

    out = forward(src, pos, packed['pd'], packed['pf'], packed['sel'])
    out = jax.block_until_ready(out)

    ref = reference_forward(src, pos, layer_params)
    assert out.shape == (SEQ, BATCH, D_MODEL)
    np.testing.assert_allclose(np.asarray(out), np.asarray(ref), rtol=2e-3, atol=2e-3)
    print("KERNEL_OK")
</pallas_src>

<mosaic_0001>
module attributes {stable_mosaic.version = 11 : i64} {
  func.func @kernel(%arg0: i32, %arg1: memref<16x32xf32, #tpu.memory_space<vmem>>, %arg2: memref<16x8xf32, #tpu.memory_space<vmem>>, %arg3: memref<1x336x32xf32, #tpu.memory_space<vmem>>, %arg4: memref<1x40x64xf32, #tpu.memory_space<vmem>>, %arg5: memref<8x32xf32, #tpu.memory_space<vmem>>, %arg6: memref<8x32xf32, #tpu.memory_space<vmem>>) attributes {dimension_semantics = [#tpu.dimension_semantics<arbitrary>], iteration_bounds = array<i64: 2>, scalar_prefetch = 0 : i64, scratch_operands = 1 : i64, tpu.core_type = #tpu.core_type<tc>, window_params = [{pipeline_mode = #tpu.pipeline_mode<synchronous>, transform_indices = @transform_0, window_bounds = array<i64: 16, 32>}, {pipeline_mode = #tpu.pipeline_mode<synchronous>, transform_indices = @transform_1, window_bounds = array<i64: 16, 8>}, {transform_indices = @transform_2, window_bounds = array<i64: 1, 336, 32>}, {transform_indices = @transform_3, window_bounds = array<i64: 1, 40, 64>}, {pipeline_mode = #tpu.pipeline_mode<synchronous>, transform_indices = @transform_4, window_bounds = array<i64: 8, 32>}]} {
    %c0_i32 = arith.constant 0 : i32
    %0 = arith.cmpi eq, %arg0, %c0_i32 : i32
    %1 = arith.extui %0 : i1 to i32
    %c0_i32_0 = arith.constant 0 : i32
    %2 = arith.cmpi ne, %1, %c0_i32_0 : i32
    scf.if %2 {
      %c0_60 = arith.constant 0 : index
      %c0_61 = arith.constant 0 : index
      %113 = vector.load %arg1[%c0_60, %c0_61] : memref<16x32xf32, #tpu.memory_space<vmem>>, vector<8x32xf32>
      %c0_62 = arith.constant 0 : index
      %c0_63 = arith.constant 0 : index
      %114 = vector.load %arg6[%c0_62, %c0_63] : memref<8x32xf32, #tpu.memory_space<vmem>>, vector<8x32xf32>
      tpu.vector_store %arg6[%c0_62, %c0_63], %113 {strides = array<i32>} : memref<8x32xf32, #tpu.memory_space<vmem>>, vector<8x32xf32>,
    } else {
    }
    %c8 = arith.constant 8 : index
    %c0 = arith.constant 0 : index
    %3 = vector.load %arg1[%c8, %c0] : memref<16x32xf32, #tpu.memory_space<vmem>>, vector<8x32xf32>
    %c0_1 = arith.constant 0 : index
    %c0_2 = arith.constant 0 : index
    %4 = vector.load %arg6[%c0_1, %c0_2] : memref<8x32xf32, #tpu.memory_space<vmem>>, vector<8x32xf32>
    %5 = arith.addf %4, %3 : vector<8x32xf32>
    %c0_3 = arith.constant 0 : index
    %c0_4 = arith.constant 0 : index
    %6 = vector.load %arg2[%c0_3, %c0_4] : memref<16x8xf32, #tpu.memory_space<vmem>>, vector<16x8xf32>
    %cst = arith.constant dense<0.000000e+00> : vector<16x32xf32>
    %7 = tpu.matmul %6, %5, %cst {dimension_numbers = #tpu.dot_dimension_numbers<[1], [0], [0], [1], [0, 0, 1, 1], [], []>} : vector<16x8xf32>, vector<8x32xf32>, vector<16x32xf32> -> vector<16x32xf32>
    %cst_5 = arith.constant dense<0.000000e+00> : vector<16x32xf32>
    %8 = tpu.matmul %6, %4, %cst_5 {dimension_numbers = #tpu.dot_dimension_numbers<[1], [0], [0], [1], [0, 0, 1, 1], [], []>} : vector<16x8xf32>, vector<8x32xf32>, vector<16x32xf32> -> vector<16x32xf32>
    %c0_6 = arith.constant 0 : index
    %c320 = arith.constant 320 : index
    %c0_7 = arith.constant 0 : index
    %9 = vector.load %arg3[%c0_6, %c320, %c0_7] : memref<1x336x32xf32, #tpu.memory_space<vmem>>, vector<1x8x32xf32>
    %10 = vector.shape_cast %9 : vector<1x8x32xf32> to vector<8x32xf32>
    %c0_8 = arith.constant 0 : index
    %c32 = arith.constant 32 : index
    %c0_9 = arith.constant 0 : index
    %11 = vector.load %arg3[%c0_8, %c32, %c0_9] : memref<1x336x32xf32, #tpu.memory_space<vmem>>, vector<1x32x32xf32>
    %12 = vector.shape_cast %11 : vector<1x32x32xf32> to vector<32x32xf32>
    %c0_10 = arith.constant 0 : index
    %c96 = arith.constant 96 : index
    %c0_11 = arith.constant 0 : index
    %13 = vector.load %arg3[%c0_10, %c96, %c0_11] : memref<1x336x32xf32, #tpu.memory_space<vmem>>, vector<1x32x32xf32>
    %14 = vector.shape_cast %13 : vector<1x32x32xf32> to vector<32x32xf32>
    %15 = vector.extract_strided_slice %7 {offsets = [0, 0], sizes = [8, 32], strides = [1, 1]} : vector<16x32xf32> to vector<8x32xf32>
    %cst_12 = arith.constant dense<0.000000e+00> : vector<8x32xf32>
    %16 = tpu.matmul %15, %12, %cst_12 {dimension_numbers = #tpu.dot_dimension_numbers<[1], [0], [0], [1], [0, 0, 1, 1], [], []>} : vector<8x32xf32>, vector<32x32xf32>, vector<8x32xf32> -> vector<8x32xf32>
    %17 = arith.addf %10, %16 : vector<8x32xf32>
    %18 = vector.extract_strided_slice %8 {offsets = [0, 0], sizes = [8, 32], strides = [1, 1]} : vector<16x32xf32> to vector<8x32xf32>
    %cst_13 = arith.constant dense<0.000000e+00> : vector<8x32xf32>
    %19 = tpu.matmul %18, %14, %cst_13 {dimension_numbers = #tpu.dot_dimension_numbers<[1], [0], [0], [1], [0, 0, 1, 1], [], []>} : vector<8x32xf32>, vector<32x32xf32>, vector<8x32xf32> -> vector<8x32xf32>
    %20 = arith.addf %10, %19 : vector<8x32xf32>
    %c0_14 = arith.constant 0 : index
    %c64 = arith.constant 64 : index
    %c0_15 = arith.constant 0 : index
    %21 = vector.load %arg3[%c0_14, %c64, %c0_15] : memref<1x336x32xf32, #tpu.memory_space<vmem>>, vector<1x32x32xf32>
    %22 = vector.shape_cast %21 : vector<1x32x32xf32> to vector<32x32xf32>
    %c0_16 = arith.constant 0 : index
    %c128 = arith.constant 128 : index
    %c0_17 = arith.constant 0 : index
    %23 = vector.load %arg3[%c0_16, %c128, %c0_17] : memref<1x336x32xf32, #tpu.memory_space<vmem>>, vector<1x32x32xf32>
    %24 = vector.shape_cast %23 : vector<1x32x32xf32> to vector<32x32xf32>
    %25 = vector.extract_strided_slice %7 {offsets = [8, 0], sizes = [8, 32], strides = [1, 1]} : vector<16x32xf32> to vector<8x32xf32>
    %cst_18 = arith.constant dense<0.000000e+00> : vector<8x32xf32>
    %26 = tpu.matmul %25, %22, %cst_18 {dimension_numbers = #tpu.dot_dimension_numbers<[1], [0], [0], [1], [0, 0, 1, 1], [], []>} : vector<8x32xf32>, vector<32x32xf32>, vector<8x32xf32> -> vector<8x32xf32>
    %27 = arith.addf %17, %26 : vector<8x32xf32>
    %28 = vector.extract_strided_slice %8 {offsets = [8, 0], sizes = [8, 32], strides = [1, 1]} : vector<16x32xf32> to vector<8x32xf32>
    %cst_19 = arith.constant dense<0.000000e+00> : vector<8x32xf32>
    %29 = tpu.matmul %28, %24, %cst_19 {dimension_numbers = #tpu.dot_dimension_numbers<[1], [0], [0], [1], [0, 0, 1, 1], [], []>} : vector<8x32xf32>, vector<32x32xf32>, vector<8x32xf32> -> vector<8x32xf32>
    %30 = arith.addf %20, %29 : vector<8x32xf32>
    %c0_20 = arith.constant 0 : index
    %c0_21 = arith.constant 0 : index
    %c0_22 = arith.constant 0 : index
    %31 = vector.load %arg3[%c0_20, %c0_21, %c0_22] : memref<1x336x32xf32, #tpu.memory_space<vmem>>, vector<1x32x32xf32>
    %32 = vector.shape_cast %31 : vector<1x32x32xf32> to vector<32x32xf32>
    %cst_23 = arith.constant dense<0.000000e+00> : vector<8x32xf32>
    %33 = tpu.matmul %5, %32, %cst_23 {dimension_numbers = #tpu.dot_dimension_numbers<[1], [0], [0], [1], [0, 0, 1, 1], [], []>} : vector<8x32xf32>, vector<32x32xf32>, vector<8x32xf32> -> vector<8x32xf32>
    %cst_24 = arith.constant dense<0.000000e+00> : vector<32x32xf32>
    %34 = tpu.matmul %27, %30, %cst_24 {dimension_numbers = #tpu.dot_dimension_numbers<[0], [0], [1], [1], [0, 1, 1, 1], [], []>} : vector<8x32xf32>, vector<8x32xf32>, vector<32x32xf32> -> vector<32x32xf32>
    %c0_25 = arith.constant 0 : index
    %c160 = arith.constant 160 : index
    %c0_26 = arith.constant 0 : index
    %35 = vector.load %arg3[%c0_25, %c160, %c0_26] : memref<1x336x32xf32, #tpu.memory_space<vmem>>, vector<1x32x32xf32>
    %36 = vector.shape_cast %35 : vector<1x32x32xf32> to vector<32x32xf32>
    %37 = arith.mulf %36, %34 : vector<32x32xf32>
    %c0_27 = arith.constant 0 : index
    %c192 = arith.constant 192 : index
    %c0_28 = arith.constant 0 : index
    %38 = vector.load %arg3[%c0_27, %c192, %c0_28] : memref<1x336x32xf32, #tpu.memory_space<vmem>>, vector<1x32x32xf32>
    %39 = vector.shape_cast %38 : vector<1x32x32xf32> to vector<32x32xf32>
    %40 = arith.addf %37, %39 : vector<32x32xf32>
    %cst_29 = arith.constant dense<0.000000e+00> : vector<8x32xf32>
    %41 = tpu.matmul %33, %40, %cst_29 {dimension_numbers = #tpu.dot_dimension_numbers<[1], [0], [0], [1], [0, 0, 1, 1], [], []>} : vector<8x32xf32>, vector<32x32xf32>, vector<8x32xf32> -> vector<8x32xf32>
    %c0_30 = arith.constant 0 : index
    %c328 = arith.constant 328 : index
    %c0_31 = arith.constant 0 : index
    %42 = vector.load %arg3[%c0_30, %c328, %c0_31] : memref<1x336x32xf32, #tpu.memory_space<vmem>>, vector<1x8x32xf32>
    %43 = vector.shape_cast %42 : vector<1x8x32xf32> to vector<8x32xf32>
    %44 = vector.extract_strided_slice %43 {offsets = [0, 0], sizes = [1, 32], strides = [1, 1]} : vector<8x32xf32> to vector<1x32xf32>
    %45 = vector.extract_strided_slice %43 {offsets = [1, 0], sizes = [1, 32], strides = [1, 1]} : vector<8x32xf32> to vector<1x32xf32>
    %46 = vector.extract_strided_slice %43 {offsets = [2, 0], sizes = [1, 32], strides = [1, 1]} : vector<8x32xf32> to vector<1x32xf32>
    %47 = vector.extract_strided_slice %43 {offsets = [3, 0], sizes = [1, 32], strides = [1, 1]} : vector<8x32xf32> to vector<1x32xf32>
    %48 = vector.extract_strided_slice %43 {offsets = [4, 0], sizes = [1, 32], strides = [1, 1]} : vector<8x32xf32> to vector<1x32xf32>
    %49 = vector.extract_strided_slice %43 {offsets = [5, 0], sizes = [1, 32], strides = [1, 1]} : vector<8x32xf32> to vector<1x32xf32>
    %c0_32 = arith.constant 0 : index
    %c224 = arith.constant 224 : index
    %c0_33 = arith.constant 0 : index
    %50 = vector.load %arg3[%c0_32, %c224, %c0_33] : memref<1x336x32xf32, #tpu.memory_space<vmem>>, vector<1x32x32xf32>
    %51 = vector.shape_cast %50 : vector<1x32x32xf32> to vector<32x32xf32>
    %cst_34 = arith.constant dense<0.000000e+00> : vector<8x32xf32>
    %52 = tpu.matmul %41, %51, %cst_34 {dimension_numbers = #tpu.dot_dimension_numbers<[1], [0], [0], [1], [0, 0, 1, 1], [], []>} : vector<8x32xf32>, vector<32x32xf32>, vector<8x32xf32> -> vector<8x32xf32>
    %53 = vector.broadcast %44 : vector<1x32xf32> to vector<8x32xf32>
    %54 = arith.addf %52, %53 : vector<8x32xf32>
    %55 = arith.addf %4, %54 : vector<8x32xf32>
    %cst_35 = arith.constant dense<0.000000e+00> : vector<8xf32>
    %56 = vector.multi_reduction <add>, %55, %cst_35 [1] : vector<8x32xf32> to vector<8xf32>
    %57 = vector.shape_cast %56 : vector<8xf32> to vector<8x1xf32>
    %cst_36 = arith.constant 3.200000e+01 : f32
    %58 = vector.broadcast %cst_36 : f32 to vector<8x1xf32>
    %59 = arith.divf %57, %58 : vector<8x1xf32>
    %60 = vector.broadcast %59 : vector<8x1xf32> to vector<8x32xf32>
    %61 = arith.subf %55, %60 : vector<8x32xf32>
    %62 = arith.mulf %61, %61 : vector<8x32xf32>
    %cst_37 = arith.constant dense<0.000000e+00> : vector<8xf32>
    %63 = vector.multi_reduction <add>, %62, %cst_37 [1] : vector<8x32xf32> to vector<8xf32>
    %64 = vector.shape_cast %63 : vector<8xf32> to vector<8x1xf32>
    %cst_38 = arith.constant 3.200000e+01 : f32
    %65 = vector.broadcast %cst_38 : f32 to vector<8x1xf32>
    %66 = arith.divf %64, %65 : vector<8x1xf32>
    %cst_39 = arith.constant 9.99999974E-6 : f32
    %67 = vector.broadcast %cst_39 : f32 to vector<8x1xf32>
    %68 = arith.addf %66, %67 : vector<8x1xf32>
    %69 = math.rsqrt %68 : vector<8x1xf32>
    %70 = vector.broadcast %69 : vector<8x1xf32> to vector<8x32xf32>
    %71 = arith.mulf %61, %70 : vector<8x32xf32>
    %72 = vector.broadcast %45 : vector<1x32xf32> to vector<8x32xf32>
    %73 = arith.mulf %71, %72 : vector<8x32xf32>
    %74 = vector.broadcast %46 : vector<1x32xf32> to vector<8x32xf32>
    %75 = arith.addf %73, %74 : vector<8x32xf32>
    %c0_40 = arith.constant 0 : index
    %c0_41 = arith.constant 0 : index
    %c0_42 = arith.constant 0 : index
    %76 = vector.load %arg4[%c0_40, %c0_41, %c0_42] : memref<1x40x64xf32, #tpu.memory_space<vmem>>, vector<1x32x64xf32>
    %77 = vector.shape_cast %76 : vector<1x32x64xf32> to vector<32x64xf32>
    %cst_43 = arith.constant dense<0.000000e+00> : vector<8x64xf32>
    %78 = tpu.matmul %75, %77, %cst_43 {dimension_numbers = #tpu.dot_dimension_numbers<[1], [0], [0], [1], [0, 0, 1, 1], [], []>} : vector<8x32xf32>, vector<32x64xf32>, vector<8x64xf32> -> vector<8x64xf32>
    %c0_44 = arith.constant 0 : index
    %c32_45 = arith.constant 32 : index
    %c0_46 = arith.constant 0 : index
    %79 = vector.load %arg4[%c0_44, %c32_45, %c0_46] : memref<1x40x64xf32, #tpu.memory_space<vmem>>, vector<1x1x64xf32>
    %80 = vector.shape_cast %79 : vector<1x1x64xf32> to vector<1x64xf32>
    %81 = vector.broadcast %80 : vector<1x64xf32> to vector<8x64xf32>
    %82 = arith.addf %78, %81 : vector<8x64xf32>
    %cst_47 = arith.constant 0.000000e+00 : f32
    %83 = vector.broadcast %cst_47 : f32 to vector<8x64xf32>
    %84 = arith.maximumf %82, %83 : vector<8x64xf32>
    %c0_48 = arith.constant 0 : index
    %c256 = arith.constant 256 : index
    %c0_49 = arith.constant 0 : index
    %85 = vector.load %arg3[%c0_48, %c256, %c0_49] : memref<1x336x32xf32, #tpu.memory_space<vmem>>, vector<1x64x32xf32>
    %86 = vector.shape_cast %85 : vector<1x64x32xf32> to vector<64x32xf32>
    %cst_50 = arith.constant dense<0.000000e+00> : vector<8x32xf32>
    %87 = tpu.matmul %84, %86, %cst_50 {dimension_numbers = #tpu.dot_dimension_numbers<[1], [0], [0], [1], [0, 0, 1, 1], [], []>} : vector<8x64xf32>, vector<64x32xf32>, vector<8x32xf32> -> vector<8x32xf32>
    %88 = vector.broadcast %47 : vector<1x32xf32> to vector<8x32xf32>
    %89 = arith.addf %87, %88 : vector<8x32xf32>
    %90 = arith.addf %75, %89 : vector<8x32xf32>
    %cst_51 = arith.constant dense<0.000000e+00> : vector<8xf32>
    %91 = vector.multi_reduction <add>, %90, %cst_51 [1] : vector<8x32xf32> to vector<8xf32>
    %92 = vector.shape_cast %91 : vector<8xf32> to vector<8x1xf32>
    %cst_52 = arith.constant 3.200000e+01 : f32
    %93 = vector.broadcast %cst_52 : f32 to vector<8x1xf32>
    %94 = arith.divf %92, %93 : vector<8x1xf32>
    %95 = vector.broadcast %94 : vector<8x1xf32> to vector<8x32xf32>
    %96 = arith.subf %90, %95 : vector<8x32xf32>
    %97 = arith.mulf %96, %96 : vector<8x32xf32>
    %cst_53 = arith.constant dense<0.000000e+00> : vector<8xf32>
    %98 = vector.multi_reduction <add>, %97, %cst_53 [1] : vector<8x32xf32> to vector<8xf32>
    %99 = vector.shape_cast %98 : vector<8xf32> to vector<8x1xf32>
    %cst_54 = arith.constant 3.200000e+01 : f32
    %100 = vector.broadcast %cst_54 : f32 to vector<8x1xf32>
    %101 = arith.divf %99, %100 : vector<8x1xf32>
    %cst_55 = arith.constant 9.99999974E-6 : f32
    %102 = vector.broadcast %cst_55 : f32 to vector<8x1xf32>
    %103 = arith.addf %101, %102 : vector<8x1xf32>
    %104 = math.rsqrt %103 : vector<8x1xf32>
    %105 = vector.broadcast %104 : vector<8x1xf32> to vector<8x32xf32>
    %106 = arith.mulf %96, %105 : vector<8x32xf32>
    %107 = vector.broadcast %48 : vector<1x32xf32> to vector<8x32xf32>
    %108 = arith.mulf %106, %107 : vector<8x32xf32>
    %109 = vector.broadcast %49 : vector<1x32xf32> to vector<8x32xf32>
    %110 = arith.addf %108, %109 : vector<8x32xf32>
    %c0_56 = arith.constant 0 : index
    %c0_57 = arith.constant 0 : index
    %111 = vector.load %arg6[%c0_56, %c0_57] : memref<8x32xf32, #tpu.memory_space<vmem>>, vector<8x32xf32>
    tpu.vector_store %arg6[%c0_56, %c0_57], %110 {strides = array<i32>} : memref<8x32xf32, #tpu.memory_space<vmem>>, vector<8x32xf32>,
    %c0_58 = arith.constant 0 : index
    %c0_59 = arith.constant 0 : index
    %112 = vector.load %arg5[%c0_58, %c0_59] : memref<8x32xf32, #tpu.memory_space<vmem>>, vector<8x32xf32>
    tpu.vector_store %arg5[%c0_58, %c0_59], %110 {strides = array<i32>} : memref<8x32xf32, #tpu.memory_space<vmem>>, vector<8x32xf32>,
    return
  }
  func.func @transform_0(%arg0: i32) -> (i32, i32) {
    %c0_i32 = arith.constant 0 : i32
    %c0_i32_0 = arith.constant 0 : i32
    %c0_i32_1 = arith.constant 0 : i32
    return %c0_i32, %c0_i32_0 : i32, i32
  }
  func.func @transform_1(%arg0: i32) -> (i32, i32) {
    %c0_i32 = arith.constant 0 : i32
    %c0_i32_0 = arith.constant 0 : i32
    %c0_i32_1 = arith.constant 0 : i32
    return %c0_i32, %c0_i32_0 : i32, i32
  }
  func.func @transform_2(%arg0: i32) -> (i32, i32, i32) {
    %c0_i32 = arith.constant 0 : i32
    %c0_i32_0 = arith.constant 0 : i32
    %c0_i32_1 = arith.constant 0 : i32
    return %arg0, %c0_i32, %c0_i32_0 : i32, i32, i32
  }
  func.func @transform_3(%arg0: i32) -> (i32, i32, i32) {
    %c0_i32 = arith.constant 0 : i32
    %c0_i32_0 = arith.constant 0 : i32
    %c0_i32_1 = arith.constant 0 : i32
    return %arg0, %c0_i32, %c0_i32_0 : i32, i32, i32
  }
  func.func @transform_4(%arg0: i32) -> (i32, i32) {
    %c0_i32 = arith.constant 0 : i32
    %c0_i32_0 = arith.constant 0 : i32
    %c0_i32_1 = arith.constant 0 : i32
    return %c0_i32, %c0_i32_0 : i32, i32
  }
}

</mosaic_0001>

<bundles_post_ra>
// kernel: forward.1
= control target key start
LH: loop header
LB: loop body
LE: loop exit
PB: predicated region body
PF: predicated region fallthrough
CT: control target
= control target key end

     0   :  { %9 = vsyncpa [#allocation4], 0  ;;  %s1712_s15 = smov 0   ;;  %s1907_s0 = inlined_call_operand.vmem [shape: f32[16,32], index: 0, kind: input, shape index: {}]   ;;  %s1908_s1 = inlined_call_operand.vmem [shape: f32[16,8], index: 1, kind: input, shape index: {}]   ;;  %s1909_s2 = inlined_call_operand.vmem [shape: f32[2,336,32], index: 2, kind: input, shape index: {}]   ;;  %s1910_s3 = inlined_call_operand.vmem [shape: f32[2,40,64], index: 3, kind: input, shape index: {}]   ;;  %s1911_s4 = inlined_call_operand.hbm [shape: f32[8,32], index: 4, kind: output, shape index: {}]  }
   0x1 LB: > { %s1718_s16 = sadd.s32 4294967295, %s1681_s15   ;;  %p1345_p0 = scmp.ge.s32.totalorder %s1681_s15, 1  ;;  %s1681_s15 = sphi %s1712_s15, %s15_s15  }
   0x2   : > { %p168_p1 = scmp.lt.s32.totalorder %s1681_s15, 3 }
   0x4   : > { %p169_p2 = pnand %p1345_p0, %p168_p1 }
   0x5   : > { %p194_p3 = scmp.lt.s32.totalorder (!%p169_p2), %s1718_s16, 1  ;;  %p1348_p4 = scmp.ne.s32.totalorder (!%p169_p2), %s1718_s16, 0 }
   0x6   : > { %172 = sbr.rel (%p169_p2) target bundleno = 2320 (0x910), region = 36 }
   0xd   : > { %s195_s17 = scalar_select %p194_p3, %s1718_s16, 1 }
   0xe   : > { %207 = sbr.rel (%p1348_p4) target bundleno = 21 (0x15), region = 40  ;;  %v208_v0 = vld [vmem:[%s1907_s0] sm:$0xff] (!%p1348_p4)  ;;  %vm209_vm0 = vcmask (!%p1348_p4), 261120  }
   0xf   : > { %s1621_s18 = smul.u32 336, %s195_s17  ;;  %210 = vst.msk [vmem:[#allocation2] sm:$0xff] (!%p1348_p4), %vm209_vm0, %v208_v0 }
  0x10   : > { %s1622_s19 = smul.u32 40, %s195_s17 }
  0x11   : > { %s1727_s22 = scalar_lea.vmem %s1909_s2, %s1621_s18 }
  0x12   : > { %s1732_s25 = scalar_lea.vmem %s1910_s3, %s1622_s19 }
  0x15 PF: > { %v211_v1 = vld [vmem:[%s1907_s0 + $0x8] sm:$0xff]  ;;  %v214_v3 = vld [vmem:[%s1908_s1] sm:$0xff]  ;;  %vm216_vm1 = vcmask 64512   ;;  %v533_v11 = vld [vmem:[%s1727_s22 + $0x50] sm:$0xff]  ;;  %v1683_v16 = vmov 0.0|0.0   ;;  %vm1684_vm2 = vmmov 0  }
  0x16   : > { %v1741_v2 = vld [vmem:[#allocation2] sm:$0xff]  ;;  %1433 = vmatprep.mubr.msk.f32.mxu0 %vm216_vm1, %v214_v3  ;;  %v215_v5 = vld [vmem:[%s1908_s1 + $0x8] sm:$0xff]  ;;  %1438 = vmatprep.mubr.msk.f32.mxu1 %vm216_vm1, %v214_v3  ;;  %v534_v13 = vld [vmem:[%s1727_s22 + $0x58] sm:$0xff]  ;;  %v1685_v19 = vmov 0.0   ;;  %vm382_vm3 = vcmask 261120   ;;  %vm1184_vm4 = vcmask 523264  }
  0x17   : > { %v1747_v4 = vadd.f32 %v1741_v2, %v211_v1  ;;  %1436 = vmatprep.subr.mxu1 %v1741_v2  ;;  %v531_v6 = vld [vmem:[%s1727_s22 + $0x40] sm:$0xff]  ;;  %v532_v7 = vld [vmem:[%s1727_s22 + $0x48] sm:$0xff]  ;;  %v376_v14 = vld [vmem:[%s1727_s22 + $0x30] sm:$0xff]  ;;  %v1572_v17 = vpack.c.bf16 %v534_v13, %v533_v11  ;;  %s1686_s8 = smov [#allocation3]   ;;  %p1627_p5 = scmp.eq.s32.totalorder %s1718_s16, 1 }
  0x18   : > { %1437 = vmatpush3.msra.mxu1 %v1741_v2  ;;  %v1569_v8 = vpack.c.bf16 %v532_v7, %v531_v6  ;;  %v374_v9 = vld [vmem:[%s1727_s22 + $0x20] sm:$0xff]  ;;  %v375_v10 = vld [vmem:[%s1727_s22 + $0x28] sm:$0xff]  ;;  %v377_v15 = vld [vmem:[%s1727_s22 + $0x38] sm:$0xff]  ;;  %s1291_s9 = sshll.u32 %s1686_s8, 4  ;;  %s1292_s9 = int_to_ptr.vmem [resolvable:$true] %s1291_s9 }
  0x19   : > { %1431 = vmatprep.subr.mxu0 %v1747_v4  ;;  %1439 = vmatmul.mubr.msk.f32.vlgmr.msra.gmra.mrb[0].mxu1 %vm216_vm1, %v215_v5  ;;  %v1557_v12 = vpack.c.bf16 %v375_v10, %v374_v9  ;;  %v1560_v18 = vpack.c.bf16 %v377_v15, %v376_v14  ;;  %v378_v20 = vld [vmem:[%s1727_s22 + $0x60] sm:$0xff]  ;;  %v379_v21 = vld [vmem:[%s1727_s22 + $0x68] sm:$0xff]  ;;  %v380_v26 = vld [vmem:[%s1727_s22 + $0x70] sm:$0xff]  ;;  %s1645_s10 = scalar_lea.vmem %s1292_s9, 128  ;;  %p1652_p9 = scmp.lt.s32.totalorder %s1292_s9, %s1292_s9 }
  0x1a   : > { %1432 = vmatpush3.msra.mxu0 %v1747_v4  ;;  %1556 = vmatprep.subr.bf16.mxu1 %v1683_v16  ;;  %v1563_v23 = vpack.c.bf16 %v379_v21, %v378_v20  ;;  %v381_v27 = vld [vmem:[%s1727_s22 + $0x78] sm:$0xff]  ;;  %v535_v30 = vld [vmem:[%s1727_s22 + $0x80] sm:$0xff]  ;;  %v536_v31 = vld [vmem:[%s1727_s22 + $0x88] sm:$0xff]  ;;  %p1646_p6 = scmp.ne.s32.totalorder %s1292_s9, %s1645_s10  ;;  %p1653_p10 = scmp.lt.s32.totalorder %s1645_s10, %s1645_s10 }
  0x1b   : > { %1434 = vmatmul.mubr.msk.f32.vlgmr.msra.gmra.mrb[0].mxu0 %vm216_vm1, %v215_v5  ;;  %1568 = vmatprep.subr.bf16.mxu0 %v1683_v16  ;;  %v1566_v29 = vpack.c.bf16 %v381_v27, %v380_v26  ;;  %v1575_v32 = vpack.c.bf16 %v536_v31, %v535_v30  ;;  %v537_v33 = vld [vmem:[%s1727_s22 + $0x90] sm:$0xff]  ;;  %v538_v34 = vld [vmem:[%s1727_s22 + $0x98] sm:$0xff]  ;;  %v373_v36 = vld [vmem:[%s1727_s22 + $0x140] sm:$0xff]  ;;  %v987_v27 = vlaneseq }
  0x1c   : > { %1570 = vmatpush3.bf16.msra.mxu0 %v1569_v8  ;;  %1558 = vmatpush3.bf16.msra.mxu1 %v1557_v12  ;;  %v1578_v35 = vpack.c.bf16 %v538_v34, %v537_v33  ;;  %v687_v46 = vld [vmem:[%s1727_s22] sm:$0xff]  ;;  %v688_v47 = vld [vmem:[%s1727_s22 + $0x8] sm:$0xff]  ;;  %v689_v49 = vld [vmem:[%s1727_s22 + $0x10] sm:$0xff]  ;;  %p1647_p7 = pnand %p1646_p6, %p1627_p5  ;;  %p1654_p11 = por %p1653_p10, %p1652_p9 }
  0x1d   : > { %1571 = vmatprep.subr.bf16.mxu0 %v1683_v16  ;;  %1559 = vmatprep.subr.bf16.mxu1 %v1683_v16  ;;  %v1581_v48 = vpack.c.bf16 %v688_v47, %v687_v46  ;;  %v690_v50 = vld [vmem:[%s1727_s22 + $0x18] sm:$0xff]  ;;  %v983_v58 = vld [vmem:[%s1727_s22 + $0xe0] sm:$0xff]  ;;  %v984_v59 = vld [vmem:[%s1727_s22 + $0xe8] sm:$0xff] }
  0x1e   : > { %1471 = vmatprep.mubr.msk.f32.mxu0 %vm1684_vm2, %v1685_v19  ;;  %1449 = vmatprep.mubr.msk.f32.mxu1 %vm1684_vm2, %v1685_v19  ;;  %v1584_v51 = vpack.c.bf16 %v690_v50, %v689_v49  ;;  %v985_v60 = vld [vmem:[%s1727_s22 + $0xf0] sm:$0xff]  ;;  %v1593_v61 = vpack.c.bf16 %v984_v59, %v983_v58  ;;  %v986_v62 = vld [vmem:[%s1727_s22 + $0xf8] sm:$0xff]  ;;  %v894_v0 = vld [vmem:[%s1727_s22 + $0xa8] sm:$0xff]  ;;  %p1648_p8 = pneg %p1647_p7 }
  0x1f   : > { %v1596_v63 = vpack.c.bf16 %v986_v62, %v985_v60  ;;  %v893_v1 = vld [vmem:[%s1727_s22 + $0xa0] sm:$0xff]  ;;  %v896_v12 = vld [vmem:[%s1727_s22 + $0xb8] sm:$0xff]  ;;  %v895_v13 = vld [vmem:[%s1727_s22 + $0xb0] sm:$0xff] }
  0x20   : > { %1573 = vmatpush3.bf16.msra.mxu0 %v1572_v17  ;;  %1561 = vmatpush3.bf16.msra.mxu1 %v1560_v18  ;;  %v901_v7 = vld [vmem:[%s1727_s22 + $0xc0] sm:$0xff]  ;;  %v904_v15 = vld [vmem:[%s1727_s22 + $0xd8] sm:$0xff]  ;;  %v903_v20 = vld [vmem:[%s1727_s22 + $0xd0] sm:$0xff]  ;;  %p1655_p12 = pnand %p1654_p11, %p1648_p8 }
  0x21   : > { %1562 = vmatprep.subr.bf16.mxu1 %v1683_v16  ;;  %1580 = vmatprep.subr.bf16.mxu0 %v1683_v16  ;;  %v1843_v30 = vld [vmem:[%s1727_s22 + $0x148] sm:$0xff]  ;;  %v1172_v46 = vld [vmem:[%s1727_s22 + $0x100] sm:$0xff]  ;;  %v1175_v50 = vld [vmem:[%s1727_s22 + $0x118] sm:$0xff] }
  0x22   : > { %v1173_v47 = vld [vmem:[%s1727_s22 + $0x108] sm:$0xff] }
  0x23   : > { %v1605_v49 = vpack.c.bf16 %v1173_v47, %v1172_v46 }
  0xec   : > { %v1440_v22 = vpop.f32.mrb[0].mxu1 }
  0xed   : > { %v364_v24 = vpop.f32.mrb[1].mxu1 }
  0xee   : > { %v1435_v25 = vpop.f32.mrb[0].mxu0 }
  0xef   : > { %v289_v28 = vpop.f32.mrb[1].mxu0  ;;  %1472 = vmatmul.mubr.msk.f32.vlgmr.msra.gmra.mrb[2].mxu0 %vm382_vm3, %v1435_v25 }
  0xf0   : > { %1450 = vmatmul.mubr.msk.f32.vlgmr.msra.gmra.mrb[2].mxu1 %vm382_vm3, %v289_v28  ;;  %1493 = vmatprep.mubr.msk.f32.mxu0 %vm1684_vm2, %v1685_v19  ;;  %v1839_v28 = vshrl.u32 %v987_v27, 7 }
  0xf1   : > { %1564 = vmatpush3.bf16.msra.mxu1 %v1563_v23  ;;  %1460 = vmatprep.mubr.msk.f32.mxu1 %vm1684_vm2, %v1685_v19 }
  0xf2   : > { %1565 = vmatprep.subr.bf16.mxu1 %v1683_v16  ;;  %1582 = vmatpush3.bf16.msra.mxu0 %v1581_v48  ;;  %v1174_v48 = vld [vmem:[%s1727_s22 + $0x110] sm:$0xff]  ;;  %v1081_v58 = vsub.s32 1, %v1839_v28  ;;  %v1086_v59 = vsub.s32 2, %v1839_v28  ;;  %v1274_v27 = vsub.s32 4, %v1839_v28 }
  0xf3   : > { %1583 = vmatprep.subr.bf16.mxu0 %v1683_v16 }
  0xf4   : > { %v1082_v60 = vrot.slane %v1843_v30, %v1081_v58 }
  0xf5   : > { %1567 = vmatpush3.bf16.msra.mxu1 %v1566_v29  ;;  %v989_v29 = vsub.s32 0, %v1839_v28 }
  0xf6   : > { %1574 = vmatprep.subr.bf16.mxu1 %v1683_v16  ;;  %1585 = vmatpush3.bf16.msra.mxu0 %v1584_v51  ;;  %v1608_v51 = vpack.c.bf16 %v1175_v50, %v1174_v48 }
  0xf7   : > { %1592 = vmatprep.subr.bf16.mxu0 %v1683_v16  ;;  %v990_v31 = vrot.slane %v1843_v30, %v989_v29  ;;  %v1279_v29 = vsub.s32 5, %v1839_v28 }
  0xf8   : > { %1461 = vmatmul.mubr.msk.f32.vlgmr.msra.gmra.mrb[4].mxu1 %vm382_vm3, %v364_v24 }
  0xf9   : > { %1576 = vmatpush3.bf16.msra.mxu1 %v1575_v32  ;;  %1482 = vmatprep.mubr.msk.f32.mxu1 %vm1684_vm2, %v1685_v19 }
  0xfa   : > { %1577 = vmatprep.subr.bf16.mxu1 %v1683_v16  ;;  %1494 = vmatmul.mubr.msk.f32.vlgmr.msra.gmra.mrb[4].mxu0 %vm382_vm3, %v1747_v4  ;;  %v902_v4 = vld [vmem:[%s1727_s22 + $0xc8] sm:$0xff] }
  0xfb   : > { %1523 = vmatprep.mubr.msk.f32.mxu0 %vm1684_vm2, %v1685_v19  ;;  %1594 = vmatpush3.bf16.msra.mxu0 %v1593_v61 }
  0xfc   : > { %1595 = vmatprep.subr.bf16.mxu0 %v1683_v16 }
  0xfd   : > { %1579 = vmatpush3.bf16.msra.mxu1 %v1578_v35 }
  0xff   : > { %1597 = vmatpush3.bf16.msra.mxu0 %v1596_v63  ;;  %v1087_v63 = vrot.slane %v1843_v30, %v1086_v59 }
 0x100   : > { %1483 = vmatmul.mubr.msk.f32.vlgmr.msra.gmra.mrb[4].mxu1 %vm382_vm3, %v1440_v22  ;;  %1604 = vmatprep.subr.bf16.mxu0 %v1683_v16 }
 0x1c2   : > { %v608_v37 = vpop.f32.mrb[2].mxu0 }
 0x1c3   : > { %v452_v38 = vpop.f32.mrb[2].mxu1  ;;  %v1473_v39 = vpop.f32.mrb[3].mxu0 }
 0x1c4   : > { %v456_v40 = vadd.f32 %v452_v38, %v373_v36  ;;  %v1451_v41 = vpop.f32.mrb[3].mxu1 }
 0x1c5   : > { %v1089_v41 = vld [vmem:[%s1732_s25] sm:$0xff] }
 0x1c6   : > { %v612_v42 = vadd.f32 %v608_v37, %v456_v40 }
 0x1c8   : > { %764 = vxpose.xlu0.b32.start.end [1/1] (short) (narrow) %v612_v42, 32  ;;  %v1090_v42 = vld [vmem:[%s1732_s25 + $0x8] sm:$0xff] }
 0x1cd   : > { %v760_v56 = vpop.f32.mrb[4].mxu0 }
 0x1ce   : > { %v1495_v57 = vpop.f32.mrb[5].mxu0 }
 0x1d3   : > { %v682_v43 = vpop.f32.mrb[4].mxu1 }
 0x1d4   : > { %v1618_v44 = vadd.f32 %v682_v43, %v373_v36  ;;  %v1484_v45 = vpop.f32.mrb[5].mxu1  ;;  %v1599_v43 = vpack.c.bf16 %v1090_v42, %v1089_v41 }
 0x1d6   : > { %1496 = vmatprep.subr.mxu1 %v1618_v44 }
 0x1d7   : > { %1497 = vmatpush3.msra.mxu1 %v1618_v44  ;;  %v1092_v44 = vld [vmem:[%s1732_s25 + $0x18] sm:$0xff] }
 0x1d8   : > { %1586 = vmatprep.subr.bf16.mxu1 %v1683_v16 }
 0x248   : > { %v780_v52 = vpop.trf.xlu0 }
 0x249   : > { %1498 = vmatprep.mubr.msk.f32.mxu1 %vm216_vm1, %v780_v52  ;;  %v1176_v52 = vld [vmem:[%s1727_s22 + $0x120] sm:$0xff] }
 0x24c   : > { %v781_v53 = vpop.trf.xlu0 }
 0x24d   : > { %1499 = vmatmul.mubr.msk.f32.vlgmr.msra.gmra.mrb[6].mxu1 %vm216_vm1, %v781_v53  ;;  %v1177_v53 = vld [vmem:[%s1727_s22 + $0x128] sm:$0xff] }
 0x250   : > { %v782_v54 = vpop.trf.xlu0 }
 0x251   : > { %1501 = vmatprep.mubr.msk.f32.mxu1 %vm216_vm1, %v782_v54  ;;  %v1611_v54 = vpack.c.bf16 %v1177_v53, %v1176_v52 }
 0x254   : > { %v783_v55 = vpop.trf.xlu0 }
 0x255   : > { %1502 = vmatmul.mubr.msk.f32.gmra.mrb[8].mxu1 %vm216_vm1, %v783_v55 }
 0x256   : > { %1512 = vmatprep.mubr.msk.f32.mxu1 %vm1684_vm2, %v1685_v19 }
 0x320   : > { %v1500_v3 = vpop.f32.mrb[6].mxu1 }
 0x321   : > { %v898_v5 = vmul.f32 %v1500_v3, %v894_v0  ;;  %v874_v6 = vpop.f32.mrb[7].mxu1  ;;  %v1179_v3 = vld [vmem:[%s1727_s22 + $0x138] sm:$0xff] }
 0x322   : > { %v897_v8 = vmul.f32 %v893_v1, %v874_v6 }
 0x323   : > { %v906_v9 = vadd.f32 %v902_v4, %v898_v5  ;;  %v1364_v5 = vld [vmem:[%s1732_s25 + $0x20] ss:$0 sm:$0xff] }
 0x324   : > { %v905_v10 = vadd.f32 %v901_v7, %v897_v8 }
 0x326   : > { %v1587_v11 = vpack.c.bf16 %v906_v9, %v905_v10  ;;  %v1182_v10 = vsub.s32 3, %v1839_v28 }
 0x328   : > { %v1503_v14 = vpop.f32.mrb[8].mxu1  ;;  %1588 = vmatpush3.bf16.msra.mxu1 %v1587_v11  ;;  %v1183_v11 = vrot.slane %v1843_v30, %v1182_v10 }
 0x329   : > { %v900_v17 = vmul.f32 %v1503_v14, %v896_v12  ;;  %v884_v18 = vpop.f32.mrb[9].mxu1  ;;  %1589 = vmatprep.subr.bf16.mxu1 %v1683_v16 }
 0x32a   : > { %v899_v21 = vmul.f32 %v895_v13, %v884_v18 }
 0x32b   : > { %v908_v22 = vadd.f32 %v904_v15, %v900_v17 }
 0x32c   : > { %v907_v23 = vadd.f32 %v903_v20, %v899_v21 }
 0x32e   : > { %v1590_v24 = vpack.c.bf16 %v908_v22, %v907_v23 }
 0x330   : > { %1591 = vmatpush3.bf16.msra.mxu1 %v1590_v24 }
 0x331   : > { %1598 = vmatprep.subr.bf16.mxu1 %v1683_v16 }
 0x333   : > { %1513 = vmatmul.mubr.msk.f32.vlgmr.msra.gmra.mrb[10].mxu1 %vm382_vm3, %v760_v56 }
 0x334   : > { %1534 = vmatprep.mubr.msk.f32.mxu1 %vm1684_vm2, %v1685_v19  ;;  %1600 = vmatpush3.bf16.msra.mxu1 %v1599_v43 }
 0x335   : > { %1601 = vmatprep.subr.bf16.mxu1 %v1683_v16 }
 0x406   : > { %v978_v25 = vpop.f32.mrb[10].mxu1 }
 0x407   : > { %v1514_v26 = vpop.f32.mrb[11].mxu1  ;;  %1524 = vmatmul.mubr.msk.f32.vlgmr.msra.gmra.mrb[6].mxu0 %vm382_vm3, %v978_v25 }
 0x408   : > { %1553 = vmatprep.mubr.msk.f32.mxu0 %vm1684_vm2, %v1685_v19  ;;  %1606 = vmatpush3.bf16.msra.mxu0 %v1605_v49 }
 0x409   : > { %1607 = vmatprep.subr.bf16.mxu0 %v1683_v16 }
 0x40c   : > { %1609 = vmatpush3.bf16.msra.mxu0 %v1608_v51 }
 0x40d   : > { %1610 = vmatprep.subr.bf16.mxu0 %v1683_v16 }
 0x410   : > { %1612 = vmatpush3.bf16.msra.mxu0 %v1611_v54 }
 0x411   : > { %1613 = vmatprep.subr.bf16.mxu0 %v1683_v16  ;;  %v1178_v16 = vld [vmem:[%s1727_s22 + $0x130] sm:$0xff] }
 0x412   : > { %v1614_v4 = vpack.c.bf16 %v1179_v3, %v1178_v16 }
 0x414   : > { %1615 = vmatpush3.bf16.msra.mxu0 %v1614_v4 }
 0x4da   : > { %v1060_v32 = vpop.f32.mrb[6].mxu0 }
 0x4db   : > { %v1061_v33 = vadd.f32 %v1060_v32, %v990_v31  ;;  %v1525_v34 = vpop.f32.mrb[7].mxu0  ;;  %v1275_v31 = vrot.slane %v1843_v30, %v1274_v27 }
 0x4dc   : > { %v1280_v34 = vrot.slane %v1843_v30, %v1279_v29 }
 0x4dd   : > { %v1064_v35 = vadd.f32 %v1061_v33, %v1741_v2  ;;  %v1091_v2 = vld [vmem:[%s1732_s25 + $0x10] sm:$0xff] }
 0x4de   : > { %v1602_v45 = vpack.c.bf16 %v1092_v44, %v1091_v2 }
 0x4df   : > { %v1065_v19 = vsel %vm382_vm3, %v1064_v35, 0.0 }
 0x4e0   : > { %1066 = vadd.xlane.f32.xlu0 %v1065_v19  ;;  %1603 = vmatpush3.bf16.msra.mxu1 %v1602_v45 }
 0x56d   : > { %v1067_v36 = vpop.xlane.xlu0 %1066 }
 0x56e   : > { %v1069_v37 = vmul.f32 0.03125, %v1067_v36 }
 0x570   : > { %v1070_v38 = vsub.f32 %v1064_v35, %v1069_v37 }
 0x572   : > { %v1071_v39 = vmul.f32 %v1070_v38, %v1070_v38 }
 0x574   : > { %v1072_v40 = vsel %vm382_vm3, %v1071_v39, 0.0 }
 0x575   : > { %1073 = vadd.xlane.f32.xlu1 %v1072_v40 }
 0x602   : > { %v1074_v55 = vpop.xlane.xlu1 %1073 }
 0x603   : > { %v1075_v56 = vmul.f32 0.03125, %v1074_v55 }
 0x605   : > { %v1076_v57 = vadd.f32 1e-05, %v1075_v56 }
 0x607   : > { %1641 = vrsqrt.f32 %v1076_v57 }
 0x611   : > { %v1642_v61 = vpop.eup %1641 }
 0x612   : > { %v1078_v62 = vmul.f32 %v1642_v61, %v1070_v38 }
 0x614   : > { %v1083_v0 = vmul.f32 %v1082_v60, %v1078_v62 }
 0x616   : > { %v1088_v1 = vadd.f32 %v1087_v63, %v1083_v0 }
 0x618   : > { %1535 = vmatmul.mubr.msk.f32.vlgmr.msra.gmra.mrb[12].mxu1 %vm382_vm3, %v1088_v1 }
 0x6eb   : > { %v1167_v6 = vpop.f32.mrb[12].mxu1 }
 0x6ec   : > { %v1168_v7 = vadd.f32 %v1364_v5, %v1167_v6  ;;  %v1536_v8 = vpop.f32.mrb[13].mxu1 }
 0x6ee   : > { %v1171_v9 = vmax.f32 %v1168_v7, 0.0 }
 0x6f0   : > { %1554 = vmatmul.mubr.msk.f32.vlgmr.msra.gmra.mrb[8].mxu0 %vm1184_vm4, %v1171_v9 }
 0x7c3   : > { %v1254_v12 = vpop.f32.mrb[8].mxu0 }
 0x7c4   : > { %v1255_v13 = vadd.f32 %v1254_v12, %v1183_v11  ;;  %v1555_v14 = vpop.f32.mrb[9].mxu0 }
 0x7c6   : > { %v1258_v15 = vadd.f32 %v1255_v13, %v1088_v1 }
 0x7c8   : > { %v1259_v17 = vsel %vm382_vm3, %v1258_v15, 0.0 }
 0x7c9   : > { %1260 = vadd.xlane.f32.xlu1 %v1259_v17 }
 0x856   : > { %v1261_v18 = vpop.xlane.xlu1 %1260 }
 0x857   : > { %v1262_v20 = vmul.f32 0.03125, %v1261_v18 }
 0x859   : > { %v1263_v21 = vsub.f32 %v1258_v15, %v1262_v20 }
 0x85b   : > { %v1264_v22 = vmul.f32 %v1263_v21, %v1263_v21 }
 0x85d   : > { %v1265_v23 = vsel %vm382_vm3, %v1264_v22, 0.0 }
 0x85e   : > { %1266 = vadd.xlane.f32.xlu1 %v1265_v23 }
 0x8eb   : > { %v1267_v24 = vpop.xlane.xlu1 %1266 }
 0x8ec   : > { %v1268_v25 = vmul.f32 0.03125, %v1267_v24 }
 0x8ee   : > { %v1269_v26 = vadd.f32 1e-05, %v1268_v25 }
 0x8f0   : > { %1643 = vrsqrt.f32 %v1269_v26 }
 0x8fa   : > { %v1644_v32 = vpop.eup %1643 }
 0x8fb   : > { %v1271_v33 = vmul.f32 %v1644_v32, %v1263_v21 }
 0x8fd   : > { %v1276_v35 = vmul.f32 %v1275_v31, %v1271_v33 }
 0x8ff   : > { %v1281_v19 = vadd.f32 %v1280_v34, %v1276_v35 }
 0x901   : > { %1282 = vst.msk [vmem:[#allocation2] sm:$0xff] %vm382_vm3, %v1281_v19  ;;  %1283 = vst.msk [vmem:[#allocation3] sm:$0xff] %vm382_vm3, %v1281_v19 }
 0x902   : > { %1658 = shalt.err (!%p1655_p12)
}
 0x903   : > { %s1659_s13 = scalar_lea.hbm %s1911_s4, 128 }
 0x904   : > { %p1660_p13 = scmp.ne.s32.totalorder %s1911_s4, %s1659_s13  ;;  %p1665_p2 = scmp.lt.u32.totalorder %s1659_s13, %s1911_s4 }
 0x906   : > { %p1661_p0 = pnand %p1660_p13, %p1627_p5 }
 0x908   : > { %p1662_p1 = pneg %p1661_p0 }
 0x90a   : > { %p1667_p3 = pnand %p1665_p2, %p1662_p1 }
 0x90c   : > { %1670 = shalt.err (!%p1667_p3)
}
 0x90d   : > { %1624 = dma.vmem_to_hbm [thread:$0]  (%p1627_p5), %s1292_s9, 128, %s1911_s4, [#allocation4]  }
 0x90e   : > { %1676 = dma.done.wait (%p1627_p5), [#allocation4], 128  }
 0x90f   : > { %1678 = vsyncadd (%p1627_p5), [#allocation4], 4294967168 }
 0x910 PF: > { %s15_s15 = sadd.s32 1, %s1681_s15  }
 0x911   : > { %p12_p4 = scmp.ge.s32.totalorder %s15_s15, 4  }
 0x913   :  { %14 = sbr.rel (!%p12_p4) target bundleno = 1 (0x1), region = 70 }
 0x91a   :  { %1304 = vsyncpa [#allocation4], 1 }
 0x91b   :  { %1306 = vsyncpa [#allocation4 + $0x1], 1 }

</bundles_post_ra>
